<compile_context>
chip_gen: v6e
topology: v6e:2x2x1
jax: 0.10.0
libtpu: 0.0.40
codegen_flags: <defaults>
</compile_context>

<pallas_src>
import functools

import jax
import jax.numpy as jnp
from jax.experimental import pallas as pl
from jax.experimental.pallas import tpu as pltpu


def _round_up(x, m):
    return ((x + m - 1) // m) * m


# ----------------------------------------------------------------------------
# Pallas kernel: fused MLM head  (Linear -> ReLU -> LayerNorm -> Linear)
#
# grid = (N // tn, V // tv); the vocab-tile axis j is the inner, sequential
# ("arbitrary") axis.  For j == 0 the kernel computes Linear1+ReLU+LayerNorm
# for the current row tile and caches the normalized activations in a VMEM
# scratch; every vocab tile then only performs the (tn, H) x (H, tv) bf16 MXU
# matmul against its W2 slice with f32 accumulation.
# ----------------------------------------------------------------------------
def mlm_head_kernel(x_ref, w1_ref, b1_ref, g_ref, beta_ref, w2_ref, b2_ref,
                    o_ref, ln_ref):
    # x_ref:  (tn, D_in) bf16   w1_ref: (D_in, H) bf16   b1_ref: (1, H) f32
    # g_ref / beta_ref: (1, H) f32 (LayerNorm affine)
    # w2_ref: (H, tv) bf16      b2_ref: (1, tv) f32
    # o_ref:  (tn, tv) bf16     ln_ref: (tn, H) f32 VMEM scratch
    @pl.when(pl.program_id(1) == 0)
    def _():
        # Linear 1 (bf16 MXU matmul, f32 accumulate) + ReLU.
        h = jnp.dot(x_ref[...], w1_ref[...],
                    preferred_element_type=jnp.float32) + b1_ref[...]
        h = jnp.maximum(h, 0.0)
        # LayerNorm over last dim (PyTorch default: biased variance, eps=1e-5).
        mean = jnp.mean(h, axis=-1, keepdims=True)
        var = jnp.mean(jnp.square(h - mean), axis=-1, keepdims=True)
        ln = (h - mean) * jax.lax.rsqrt(var + 1e-5)
        ln_ref[...] = ln * g_ref[...] + beta_ref[...]

    # Vocab projection for this (row tile, vocab tile): bf16 MXU, f32 acc.
    out = jnp.dot(ln_ref[...].astype(jnp.bfloat16), w2_ref[...],
                  preferred_element_type=jnp.float32) + b2_ref[...]
    o_ref[...] = out.astype(o_ref.dtype)


def mlm_head(masked_x, w1, b1, gamma, beta, w2, b2, *, tn=256, tv=512):
    """masked_x: (N, D_in) -> (N, vocab_size) bf16 logits."""
    N, D_in = masked_x.shape
    H = w1.shape[1]
    V = w2.shape[1]

    # Clamp tile sizes for small problems while keeping (8, 128) alignment;
    # pad N / V up to tile multiples (padded rows/cols are sliced off below).
    tn = min(tn, _round_up(N, 8))
    tv = min(tv, _round_up(V, 128))
    n_pad = _round_up(N, tn)
    v_pad = _round_up(V, tv)

    x = masked_x.astype(jnp.bfloat16)
    if n_pad != N:
        x = jnp.pad(x, ((0, n_pad - N), (0, 0)))
    w2p, b2p = w2, b2
    if v_pad != V:
        w2p = jnp.pad(w2, ((0, 0), (0, v_pad - V)))
        b2p = jnp.pad(b2, ((0, 0), (0, v_pad - V)))

    grid = (n_pad // tn, v_pad // tv)
    out = pl.pallas_call(
        mlm_head_kernel,
        out_shape=jax.ShapeDtypeStruct((n_pad, v_pad), jnp.bfloat16),
        grid_spec=pltpu.PrefetchScalarGridSpec(
            num_scalar_prefetch=0,
            grid=grid,
            in_specs=[
                pl.BlockSpec((tn, D_in), lambda i, j: (i, 0)),   # x row tile
                pl.BlockSpec((D_in, H), lambda i, j: (0, 0)),    # W1 (resident)
                pl.BlockSpec((1, H), lambda i, j: (0, 0)),       # b1
                pl.BlockSpec((1, H), lambda i, j: (0, 0)),       # gamma
                pl.BlockSpec((1, H), lambda i, j: (0, 0)),       # beta
                pl.BlockSpec((H, tv), lambda i, j: (0, j)),      # W2 vocab tile
                pl.BlockSpec((1, tv), lambda i, j: (0, j)),      # b2 vocab tile
            ],
            out_specs=pl.BlockSpec((tn, tv), lambda i, j: (i, j)),
            scratch_shapes=[pltpu.VMEM((tn, H), jnp.float32)],
        ),
        compiler_params=pltpu.CompilerParams(
            dimension_semantics=("parallel", "arbitrary"),
            vmem_limit_bytes=48 * 1024 * 1024),
    )(x, w1, b1, gamma, beta, w2p, b2p)
    return out[:N, :V]


# ----------------------------------------------------------------------------
# BERTModel forward (glue in plain JAX, MLM head in Pallas)
# ----------------------------------------------------------------------------
def bert_model_forward(params, tokens, attention_mask, pred_positions):
    # --- encoder stub (external `models` module) ---
    enc_embed = params["enc_embed"]                       # (vocab, D)
    encoded_x = jnp.take(enc_embed, tokens, axis=0)       # (B, S, D)
    encoded_x = encoded_x * attention_mask[..., None].astype(encoded_x.dtype)

    # --- MaskLM gather:  masked_X = X[batch_idx, pred_positions] ---
    # TODO(synk): this gather could be fused into the kernel via scalar
    # prefetch of the flattened row indices; left in XLA (modest win at small N).
    B, S, D = encoded_x.shape
    P = pred_positions.shape[1]
    batch_idx = jnp.repeat(jnp.arange(B), P)              # repeat_interleave
    flat_pos = pred_positions.reshape(-1)
    masked_x = encoded_x[batch_idx, flat_pos]             # (B*P, D)

    # --- fused MLM head kernel ---
    mlm_flat = mlm_head(masked_x,
                        params["w1"], params["b1"],
                        params["ln_gamma"], params["ln_beta"],
                        params["w2"], params["b2"])       # (B*P, V) bf16
    mlm_y_hat = mlm_flat.reshape(B, P, -1)
    return encoded_x, mlm_y_hat


def init_params(key, vocab_size, num_hiddens, mlm_in_features):
    ks = jax.random.split(key, 6)
    scale = 0.02
    return {
        "enc_embed": scale * jax.random.normal(
            ks[0], (vocab_size, mlm_in_features), jnp.float32),
        # Matmul weights stored in bf16 (MXU-native, half the HBM traffic).
        "w1": (scale * jax.random.normal(
            ks[1], (mlm_in_features, num_hiddens), jnp.float32)
               ).astype(jnp.bfloat16),
        "b1": jnp.zeros((1, num_hiddens), jnp.float32),
        "ln_gamma": jnp.ones((1, num_hiddens), jnp.float32),
        "ln_beta": jnp.zeros((1, num_hiddens), jnp.float32),
        "w2": (scale * jax.random.normal(
            ks[2], (num_hiddens, vocab_size), jnp.float32)
               ).astype(jnp.bfloat16),
        "b2": jnp.zeros((1, vocab_size), jnp.float32),
    }


if __name__ == "__main__":
    # Small, forward-consistent shapes.
    B, S = 2, 8
    vocab_size = 64
    num_hiddens = 32
    mlm_in_features = 32
    num_pred = 4

    key = jax.random.PRNGKey(0)
    k_tok, k_pos, k_params = jax.random.split(key, 3)

    tokens = jax.random.randint(k_tok, (B, S), 0, vocab_size, dtype=jnp.int32)
    attention_mask = jnp.ones((B, S), dtype=jnp.int32)
    pred_positions = jax.random.randint(
        k_pos, (B, num_pred), 0, S, dtype=jnp.int32)

    params = init_params(k_params, vocab_size, num_hiddens, mlm_in_features)

    encoded_x, mlm_y_hat = jax.jit(
        functools.partial(bert_model_forward, params)
    )(tokens, attention_mask, pred_positions)
    jax.block_until_ready((encoded_x, mlm_y_hat))

    assert encoded_x.shape == (B, S, mlm_in_features)
    assert mlm_y_hat.shape == (B, num_pred, vocab_size)

    # Pure-JAX reference check of the Pallas MLM head (mirrors kernel dtypes:
    # bf16 matmul operands, f32 accumulation / LayerNorm).
    batch_idx = jnp.repeat(jnp.arange(B), num_pred)
    masked_x = encoded_x[batch_idx, pred_positions.reshape(-1)]
    xb = masked_x.astype(jnp.bfloat16).astype(jnp.float32)
    w1f = params["w1"].astype(jnp.float32)
    w2f = params["w2"].astype(jnp.float32)
    h = jnp.maximum(xb @ w1f + params["b1"], 0.0)
    mu = h.mean(-1, keepdims=True)
    var = ((h - mu) ** 2).mean(-1, keepdims=True)
    ln = (h - mu) / jnp.sqrt(var + 1e-5) * params["ln_gamma"] + params["ln_beta"]
    lnb = ln.astype(jnp.bfloat16).astype(jnp.float32)
    ref = (lnb @ w2f + params["b2"]).reshape(B, num_pred, vocab_size)
    assert jnp.allclose(mlm_y_hat.astype(jnp.float32), ref,
                        atol=2e-2, rtol=2e-2)

    print("KERNEL_OK")
</pallas_src>

<mosaic_0001>
module attributes {stable_mosaic.version = 11 : i64} {
  func.func @mlm_head_kernel(%arg0: i32, %arg1: i32, %arg2: memref<8x32xbf16, #tpu.memory_space<vmem>>, %arg3: memref<32x32xbf16, #tpu.memory_space<vmem>>, %arg4: memref<1x32xf32, #tpu.memory_space<vmem>>, %arg5: memref<1x32xf32, #tpu.memory_space<vmem>>, %arg6: memref<1x32xf32, #tpu.memory_space<vmem>>, %arg7: memref<32x128xbf16, #tpu.memory_space<vmem>>, %arg8: memref<1x128xf32, #tpu.memory_space<vmem>>, %arg9: memref<8x128xbf16, #tpu.memory_space<vmem>>, %arg10: memref<8x32xf32, #tpu.memory_space<vmem>>) attributes {dimension_semantics = [#tpu.dimension_semantics<parallel>, #tpu.dimension_semantics<arbitrary>], iteration_bounds = array<i64: 1, 1>, scalar_prefetch = 0 : i64, scratch_operands = 1 : i64, tpu.core_type = #tpu.core_type<tc>, window_params = [{transform_indices = @transform_0, window_bounds = array<i64: 8, 32>}, {pipeline_mode = #tpu.pipeline_mode<synchronous>, transform_indices = @transform_1, window_bounds = array<i64: 32, 32>}, {pipeline_mode = #tpu.pipeline_mode<synchronous>, transform_indices = @transform_2, window_bounds = array<i64: 1, 32>}, {pipeline_mode = #tpu.pipeline_mode<synchronous>, transform_indices = @transform_3, window_bounds = array<i64: 1, 32>}, {pipeline_mode = #tpu.pipeline_mode<synchronous>, transform_indices = @transform_4, window_bounds = array<i64: 1, 32>}, {transform_indices = @transform_5, window_bounds = array<i64: 32, 128>}, {transform_indices = @transform_6, window_bounds = array<i64: 1, 128>}, {transform_indices = @transform_7, window_bounds = array<i64: 8, 128>}]} {
    %c0_i32 = arith.constant 0 : i32
    %0 = arith.cmpi eq, %arg1, %c0_i32 : i32
    %1 = arith.extui %0 : i1 to i32
    %c0_i32_0 = arith.constant 0 : i32
    %2 = arith.cmpi ne, %1, %c0_i32_0 : i32
    scf.if %2 {
      %c0_8 = arith.constant 0 : index
      %c0_9 = arith.constant 0 : index
      %12 = vector.load %arg2[%c0_8, %c0_9] : memref<8x32xbf16, #tpu.memory_space<vmem>>, vector<8x32xbf16>
      %c0_10 = arith.constant 0 : index
      %c0_11 = arith.constant 0 : index
      %13 = vector.load %arg3[%c0_10, %c0_11] : memref<32x32xbf16, #tpu.memory_space<vmem>>, vector<32x32xbf16>
      %cst_12 = arith.constant dense<0.000000e+00> : vector<8x32xf32>
      %14 = tpu.matmul %12, %13, %cst_12 {dimension_numbers = #tpu.dot_dimension_numbers<[1], [0], [0], [1], [0, 0, 1, 1], [], []>} : vector<8x32xbf16>, vector<32x32xbf16>, vector<8x32xf32> -> vector<8x32xf32>
      %c0_13 = arith.constant 0 : index
      %c0_14 = arith.constant 0 : index
      %15 = vector.load %arg4[%c0_13, %c0_14] : memref<1x32xf32, #tpu.memory_space<vmem>>, vector<1x32xf32>
      %16 = vector.broadcast %15 : vector<1x32xf32> to vector<8x32xf32>
      %17 = arith.addf %14, %16 : vector<8x32xf32>
      %cst_15 = arith.constant 0.000000e+00 : f32
      %18 = vector.broadcast %cst_15 : f32 to vector<8x32xf32>
      %19 = arith.maximumf %17, %18 : vector<8x32xf32>
      %cst_16 = arith.constant dense<0.000000e+00> : vector<8xf32>
      %20 = vector.multi_reduction <add>, %19, %cst_16 [1] : vector<8x32xf32> to vector<8xf32>
      %21 = vector.shape_cast %20 : vector<8xf32> to vector<8x1xf32>
      %cst_17 = arith.constant 3.200000e+01 : f32
      %22 = vector.broadcast %cst_17 : f32 to vector<8x1xf32>
      %23 = arith.divf %21, %22 : vector<8x1xf32>
      %24 = vector.broadcast %23 : vector<8x1xf32> to vector<8x32xf32>
      %25 = arith.subf %19, %24 : vector<8x32xf32>
      %26 = arith.mulf %25, %25 : vector<8x32xf32>
      %cst_18 = arith.constant dense<0.000000e+00> : vector<8xf32>
      %27 = vector.multi_reduction <add>, %26, %cst_18 [1] : vector<8x32xf32> to vector<8xf32>
      %28 = vector.shape_cast %27 : vector<8xf32> to vector<8x1xf32>
      %cst_19 = arith.constant 3.200000e+01 : f32
      %29 = vector.broadcast %cst_19 : f32 to vector<8x1xf32>
      %30 = arith.divf %28, %29 : vector<8x1xf32>
      %31 = vector.broadcast %23 : vector<8x1xf32> to vector<8x32xf32>
      %32 = arith.subf %19, %31 : vector<8x32xf32>
      %cst_20 = arith.constant 9.99999974E-6 : f32
      %33 = vector.broadcast %cst_20 : f32 to vector<8x1xf32>
      %34 = arith.addf %30, %33 : vector<8x1xf32>
      %35 = math.rsqrt %34 : vector<8x1xf32>
      %36 = vector.broadcast %35 : vector<8x1xf32> to vector<8x32xf32>
      %37 = arith.mulf %32, %36 : vector<8x32xf32>
      %c0_21 = arith.constant 0 : index
      %c0_22 = arith.constant 0 : index
      %38 = vector.load %arg5[%c0_21, %c0_22] : memref<1x32xf32, #tpu.memory_space<vmem>>, vector<1x32xf32>
      %39 = vector.broadcast %38 : vector<1x32xf32> to vector<8x32xf32>
      %40 = arith.mulf %37, %39 : vector<8x32xf32>
      %c0_23 = arith.constant 0 : index
      %c0_24 = arith.constant 0 : index
      %41 = vector.load %arg6[%c0_23, %c0_24] : memref<1x32xf32, #tpu.memory_space<vmem>>, vector<1x32xf32>
      %42 = vector.broadcast %41 : vector<1x32xf32> to vector<8x32xf32>
      %43 = arith.addf %40, %42 : vector<8x32xf32>
      %c0_25 = arith.constant 0 : index
      %c0_26 = arith.constant 0 : index
      %44 = vector.load %arg10[%c0_25, %c0_26] : memref<8x32xf32, #tpu.memory_space<vmem>>, vector<8x32xf32>
      tpu.vector_store %arg10[%c0_25, %c0_26], %43 {strides = array<i32>} : memref<8x32xf32, #tpu.memory_space<vmem>>, vector<8x32xf32>,
    } else {
    }
    %c0 = arith.constant 0 : index
    %c0_1 = arith.constant 0 : index
    %3 = vector.load %arg10[%c0, %c0_1] : memref<8x32xf32, #tpu.memory_space<vmem>>, vector<8x32xf32>
    %4 = arith.truncf %3 : vector<8x32xf32> to vector<8x32xbf16>
    %c0_2 = arith.constant 0 : index
    %c0_3 = arith.constant 0 : index
    %5 = vector.load %arg7[%c0_2, %c0_3] : memref<32x128xbf16, #tpu.memory_space<vmem>>, vector<32x128xbf16>
    %cst = arith.constant dense<0.000000e+00> : vector<8x128xf32>
    %6 = tpu.matmul %4, %5, %cst {dimension_numbers = #tpu.dot_dimension_numbers<[1], [0], [0], [1], [0, 0, 1, 1], [], []>} : vector<8x32xbf16>, vector<32x128xbf16>, vector<8x128xf32> -> vector<8x128xf32>
    %c0_4 = arith.constant 0 : index
    %c0_5 = arith.constant 0 : index
    %7 = vector.load %arg8[%c0_4, %c0_5] : memref<1x128xf32, #tpu.memory_space<vmem>>, vector<1x128xf32>
    %8 = vector.broadcast %7 : vector<1x128xf32> to vector<8x128xf32>
    %9 = arith.addf %6, %8 : vector<8x128xf32>
    %10 = arith.truncf %9 : vector<8x128xf32> to vector<8x128xbf16>
    %c0_6 = arith.constant 0 : index
    %c0_7 = arith.constant 0 : index
    %11 = vector.load %arg9[%c0_6, %c0_7] : memref<8x128xbf16, #tpu.memory_space<vmem>>, vector<8x128xbf16>
    tpu.vector_store %arg9[%c0_6, %c0_7], %10 {strides = array<i32>} : memref<8x128xbf16, #tpu.memory_space<vmem>>, vector<8x128xbf16>,
    return
  }
  func.func @transform_0(%arg0: i32, %arg1: i32) -> (i32, i32) {
    %c0_i32 = arith.constant 0 : i32
    %c0_i32_0 = arith.constant 0 : i32
    return %arg0, %c0_i32 : i32, i32
  }
  func.func @transform_1(%arg0: i32, %arg1: i32) -> (i32, i32) {
    %c0_i32 = arith.constant 0 : i32
    %c0_i32_0 = arith.constant 0 : i32
    %c0_i32_1 = arith.constant 0 : i32
    return %c0_i32, %c0_i32_0 : i32, i32
  }
  func.func @transform_2(%arg0: i32, %arg1: i32) -> (i32, i32) {
    %c0_i32 = arith.constant 0 : i32
    %c0_i32_0 = arith.constant 0 : i32
    %c0_i32_1 = arith.constant 0 : i32
    return %c0_i32, %c0_i32_0 : i32, i32
  }
  func.func @transform_3(%arg0: i32, %arg1: i32) -> (i32, i32) {
    %c0_i32 = arith.constant 0 : i32
    %c0_i32_0 = arith.constant 0 : i32
    %c0_i32_1 = arith.constant 0 : i32
    return %c0_i32, %c0_i32_0 : i32, i32
  }
  func.func @transform_4(%arg0: i32, %arg1: i32) -> (i32, i32) {
    %c0_i32 = arith.constant 0 : i32
    %c0_i32_0 = arith.constant 0 : i32
    %c0_i32_1 = arith.constant 0 : i32
    return %c0_i32, %c0_i32_0 : i32, i32
  }
  func.func @transform_5(%arg0: i32, %arg1: i32) -> (i32, i32) {
    %c0_i32 = arith.constant 0 : i32
    %c0_i32_0 = arith.constant 0 : i32
    return %c0_i32, %arg1 : i32, i32
  }
  func.func @transform_6(%arg0: i32, %arg1: i32) -> (i32, i32) {
    %c0_i32 = arith.constant 0 : i32
    %c0_i32_0 = arith.constant 0 : i32
    return %c0_i32, %arg1 : i32, i32
  }
  func.func @transform_7(%arg0: i32, %arg1: i32) -> (i32, i32) {
    %c0_i32 = arith.constant 0 : i32
    return %arg0, %arg1 : i32, i32
  }
}

</mosaic_0001>

<bundles_post_ra>
// kernel: bert_model_forward.1
= control target key start
LH: loop header
LB: loop body
LE: loop exit
PB: predicated region body
PF: predicated region fallthrough
CT: control target
= control target key end

     0   :  { %v280_v1 = vmov 0.0   ;;  %vm281_vm0 = vmmov 0   ;;  %s358_s0 = inlined_call_operand.vmem [shape: bf16[8,32], index: 0, kind: input, shape index: {}]   ;;  %s359_s1 = inlined_call_operand.vmem [shape: bf16[32,32], index: 1, kind: input, shape index: {}]   ;;  %s360_s2 = inlined_call_operand.vmem [shape: f32[1,32], index: 2, kind: input, shape index: {}, may-alias: {2,4}]   ;;  %s361_s3 = inlined_call_operand.vmem [shape: f32[1,32], index: 3, kind: input, shape index: {}]   ;;  %s362_s4 = inlined_call_operand.vmem [shape: f32[1,32], index: 4, kind: input, shape index: {}, may-alias: {2,4}]   ;;  %s363_s5 = inlined_call_operand.vmem [shape: bf16[32,128], index: 5, kind: input, shape index: {}]   ;;  %s364_s6 = inlined_call_operand.vmem [shape: f32[1,128], index: 6, kind: input, shape index: {}]   ;;  %s365_s7 = inlined_call_operand.hbm [shape: bf16[8,128], index: 7, kind: output, shape index: {}]  }
   0x1   :  { %v252_v0 = vld [vmem:[%s359_s1 + $0x8] sm:$0xff]   ;;  %233 = vmatprep.subr.bf16.mxu0 %v280_v1  ;;  %241 = vmatprep.subr.bf16.mxu1 %v280_v1  ;;  %v253_v2 = vld [vmem:[%s359_s1] sm:$0xff]  }
   0x2   :  { %234 = vmatpush3.bf16.msra.mxu0 %v252_v0  ;;  %237 = vmatprep.mubr.msk.bf16.mxu0 %vm281_vm0, %v280_v1 }
   0x3   :  { %235 = vmatprep.subr.bf16.mxu0 %v280_v1  ;;  %245 = vmatprep.mubr.msk.bf16.mxu1 %vm281_vm0, %v280_v1 }
   0x4   :  { %12 = vsyncpa [#allocation4], 0  ;;  %v32_v3 = vld [vmem:[%s358_s0] sm:$0xf]  ;;  %vm56_vm1 = vcmask 261120   ;;  %v254_v17 = vld [vmem:[%s363_s5 + $0x8] sm:$0xff]  }
   0x5   :  { %v217_v4 = vld [vmem:[%s360_s2] ss:$0 sm:$0xff]  ;;  %242 = vmatpush3.bf16.msra.mxu1 %v254_v17  ;;  %s282_s15 = smov [#allocation3]  }
   0x6   :  { %236 = vmatpush3.bf16.msra.mxu0 %v253_v2  ;;  %v255_v18 = vld [vmem:[%s363_s5] sm:$0xff]   ;;  %243 = vmatprep.subr.bf16.mxu1 %v280_v1 }
   0x7   :  { %v221_v23 = vld [vmem:[%s361_s3] ss:$0 sm:$0xff]  ;;  %s209_s3 = sshll.u32 %s282_s15, 4  ;;  %s210_s3 = int_to_ptr.vmem [resolvable:$true] %s209_s3 }
   0x8   :  { %v222_v25 = vld [vmem:[%s362_s4] ss:$0 sm:$0xff]  ;;  %s258_s4 = scalar_lea.vmem %s210_s3, 64  ;;  %p263_p1 = scmp.lt.s32.totalorder %s210_s3, %s210_s3 }
   0x9   :  { %238 = vmatmul.mubr.msk.bf16.vlgmr.msra.gmra.mxu0 %vm56_vm1, %v32_v3  ;;  %244 = vmatpush3.bf16.msra.mxu1 %v255_v18  ;;  %v223_v30 = vld [vmem:[%s364_s6] ss:$0 sm:$0xff]  ;;  %p259_p0 = scmp.ne.s32.totalorder %s210_s3, %s258_s4  ;;  %p264_p2 = scmp.lt.s32.totalorder %s258_s4, %s258_s4 }
   0xb   :  { %p265_p3 = por %p264_p2, %p263_p1 }
   0xd   :  { %p266_p4 = pnand %p265_p3, %p259_p0 }
  0xc9   :  { %v94_v5 = vpop.f32.mrf.mxu0 }
  0xca   :  { %v95_v6 = vadd.f32 %v217_v4, %v94_v5 }
  0xcb   :  { %v239_v7 = vpop.f32.mrf.mxu0 }
  0xcc   :  { %v100_v8 = vmax.f32 %v95_v6, 0.0 }
  0xcd   :  { %v97_v9 = vpop.f32.mrf.mxu0 }
  0xce   :  { %v101_v10 = vsel %vm56_vm1, %v100_v8, 0.0 }
  0xcf   :  { %102 = vadd.xlane.f32.xlu0 %v101_v10  ;;  %v240_v11 = vpop.f32.mrf.mxu0 }
 0x158   :  { %v103_v12 = vpop.xlane.xlu0 %102 }
 0x159   :  { %v105_v13 = vmul.f32 0.03125, %v103_v12 }
 0x15b   :  { %v106_v14 = vsub.f32 %v100_v8, %v105_v13 }
 0x15d   :  { %v107_v15 = vmul.f32 %v106_v14, %v106_v14 }
 0x15f   :  { %v108_v16 = vsel %vm56_vm1, %v107_v15, 0.0 }
 0x160   :  { %109 = vadd.xlane.f32.xlu0 %v108_v16 }
 0x1e9   :  { %v110_v19 = vpop.xlane.xlu0 %109 }
 0x1ea   :  { %v111_v20 = vmul.f32 0.03125, %v110_v19 }
 0x1ec   :  { %v112_v21 = vadd.f32 1e-05, %v111_v20 }
 0x1ee   :  { %256 = vrsqrt.f32 %v112_v21 }
 0x1fb   :  { %v257_v22 = vpop.eup %256 }
 0x1fc   :  { %v114_v24 = vmul.f32 %v257_v22, %v106_v14 }
 0x1fe   :  { %v122_v26 = vmul.f32 %v221_v23, %v114_v24 }
 0x200   :  { %v130_v27 = vadd.f32 %v222_v25, %v122_v26 }
 0x202   :  { %131 = vst.msk [vmem:[#allocation2] sm:$0xff] %vm56_vm1, %v130_v27 }
 0x209   :  { %v132_v28 = vld [vmem:[#allocation2] sm:$0xff] }
 0x20a   :  { %v133_v29 = vpack.c.bf16 %v132_v28, %v132_v28 }
 0x20c   :  { %246 = vmatmul.mubr.msk.bf16.vlgmr.msra.gmra.mxu1 %vm56_vm1, %v133_v29 }
 0x2cc   :  { %v195_v31 = vpop.f32.mrf.mxu1 }
 0x2cd   :  { %v196_v32 = vadd.f32 %v223_v30, %v195_v31 }
 0x2ce   :  { %v247_v33 = vpop.f32.mrf.mxu1 }
 0x2cf   :  { %v201_v34 = vpack.c.bf16 %v196_v32, %v196_v32 }
 0x2d0   :  { %v198_v35 = vpop.f32.mrf.mxu1 }
 0x2d1   :  { %202 = vst [vmem:[#allocation3] sm:$0xf] %v201_v34 }
 0x2d2   :  { %v248_v36 = vpop.f32.mrf.mxu1 }
 0x2d3   :  { %269 = shalt.err (!%p266_p4)
}
 0x2d4   :  { %212 = dma.vmem_to_hbm [thread:$0]  %s210_s3, 64, %s365_s7, [#allocation4]  }
 0x2d5   :  { %278 = dma.done.wait [#allocation4], 64  }
 0x2d6   :  { %279 = vsyncadd [#allocation4], 4294967232 }
 0x2d7   :  { %216 = vsyncpa [#allocation4], 1 }

</bundles_post_ra>
